<compile_context>
chip_gen: v5e
topology: v5e:2x2
jax: 0.10.0
libtpu: 0.0.40
codegen_flags: <defaults>
</compile_context>

<pallas_src>
import functools

import jax
import jax.numpy as jnp
from jax import lax
from jax.experimental import pallas as pl
from jax.experimental.pallas import tpu as pltpu


_TARGET_STEP_BYTES = 4 * 1024 * 1024     # >= 2-4 MiB input DMA per grid step
_MAX_STEP_PIXELS = 256 * 1024            # lane budget cap per step
_MIN_STEP_PIXELS = 1024                  # >= one (8, 128) vreg tile
_VMEM_LIMIT_BYTES = 32 * 1024 * 1024     # safe on v5e/v6e/v7x, > v5e 16 MiB default


def _valid_mask(j, rows, cols, total_pixels, block_pixels):
    """(rows, cols) bool mask of in-range pixels for the (ragged) last chunk j."""
    r = lax.broadcasted_iota(jnp.int32, (rows, cols), 0)
    c = lax.broadcasted_iota(jnp.int32, (rows, cols), 1)
    rem = total_pixels - j * block_pixels           # 0 < rem <= block_pixels
    return (r * cols + c) < rem


def _class1_prob_slabs(x, n_classes, binary):
    """Class-1 softmax probability; x is (C, ts, 128) with channel leading, so
    every op below is an elementwise VPU/EUP op on a dense (ts, 128) slab."""
    if binary:
        # softmax(x)[1] == sigmoid(x1 - x0); numerically stable form.
        d = x[1] - x[0]
        z = jnp.exp(-jnp.abs(d))
        inv = pl.reciprocal(1.0 + z, approx=False)
        return jnp.where(d >= 0, inv, z * inv)
    m = x[0]
    for k in range(1, n_classes):
        m = jnp.maximum(m, x[k])
    e1 = jnp.exp(x[1] - m)
    den = jnp.exp(x[0] - m) + e1
    for k in range(2, n_classes):
        den = den + jnp.exp(x[k] - m)
    return e1 * pl.reciprocal(den, approx=False)


def _dice_kernel_fold(x_ref, t_ref, out_ref, *, n_classes, binary, ragged,
                      total_pixels, block_pixels):
    # x_ref: (C, ts, 128) logits; t_ref: (1, ts, 128) labels
    # out_ref: (2, 128) resident per-batch accumulator
    #   row 0: lane-wise partials of sum(p1 * t), row 1: of sum(p1 + t)
    j = pl.program_id(1)

    @pl.when(j == 0)
    def _():
        out_ref[...] = jnp.zeros_like(out_ref)

    x = x_ref[...].astype(jnp.float32)          # (C, ts, 128)
    t = t_ref[...][0].astype(jnp.float32)       # (ts, 128)
    ts, lanes = t.shape

    def accumulate(valid):
        xx, tt = x, t
        if valid is not None:
            # Boundary blocks are NOT zero-filled: mask logits to a finite
            # value BEFORE exp and drop out-of-range pixels from both sums.
            xx = jnp.where(valid, xx, 0.0)
            tt = jnp.where(valid, tt, 0.0)
        p1 = _class1_prob_slabs(xx, n_classes, binary)        # (ts, 128)
        if valid is not None:
            p1 = jnp.where(valid, p1, 0.0)
        inter = jnp.sum(p1 * tt, axis=0, keepdims=True)       # (1, 128)
        sums = jnp.sum(p1 + tt, axis=0, keepdims=True)        # (1, 128)
        out_ref[0:1, :] = out_ref[0:1, :] + inter
        out_ref[1:2, :] = out_ref[1:2, :] + sums

    if ragged:
        last = pl.num_programs(1) - 1

        @pl.when(j < last)
        def _():
            accumulate(None)

        @pl.when(j == last)
        def _():
            accumulate(_valid_mask(j, ts, lanes, total_pixels, block_pixels))
    else:
        accumulate(None)


def _dice_kernel_flat(x_ref, t_ref, out_ref, *, n_classes, binary, ragged,
                      total_pixels, block_pixels):
    # Fallback for H*W % 128 != 0: pixels stay on the lane axis (no fold).
    # x_ref: (C, tl); t_ref: (1, tl); out_ref: (2, tl) resident accumulator.
    j = pl.program_id(1)

    @pl.when(j == 0)
    def _():
        out_ref[...] = jnp.zeros_like(out_ref)

    x = x_ref[...].astype(jnp.float32)          # (C, tl)
    t = t_ref[...].astype(jnp.float32)          # (1, tl)
    tl = x.shape[-1]

    def accumulate(valid):
        xx, tt = x, t
        if valid is not None:
            xx = jnp.where(valid, xx, 0.0)      # mask logits BEFORE exp
            tt = jnp.where(valid, tt, 0.0)
        if binary:
            d = xx[1:2, :] - xx[0:1, :]
            z = jnp.exp(-jnp.abs(d))
            inv = pl.reciprocal(1.0 + z, approx=False)
            p1 = jnp.where(d >= 0, inv, z * inv)
        else:
            m = jnp.max(xx, axis=0, keepdims=True)
            e = jnp.exp(xx - m)
            den = jnp.sum(e, axis=0, keepdims=True)
            p1 = e[1:2, :] * pl.reciprocal(den, approx=False)
        if valid is not None:
            p1 = jnp.where(valid, p1, 0.0)
        out_ref[0:1, :] = out_ref[0:1, :] + p1 * tt
        out_ref[1:2, :] = out_ref[1:2, :] + (p1 + tt)

    if ragged:
        last = pl.num_programs(1) - 1

        @pl.when(j < last)
        def _():
            accumulate(None)

        @pl.when(j == last)
        def _():
            accumulate(_valid_mask(j, 1, tl, total_pixels, block_pixels))
    else:
        accumulate(None)


def dice_loss_stack(inp, target, smooth=1.0):
    """inp: (N, C, H, W) logits; target: (N, H, W) labels (any numeric dtype)."""
    n, c, h, w = inp.shape
    assert c >= 2, "DiceLossStack takes softmax class index 1; need C >= 2"
    assert target.shape == (n, h, w)
    l = h * w
    binary = (c == 2)

    # Pixels per grid step: big enough to amortize the ~0.35 us per-step cost,
    # small enough (scaled ~1/C by the byte budget) to stay well inside VMEM.
    bytes_per_pixel = c * inp.dtype.itemsize + target.dtype.itemsize
    step_pixels = _TARGET_STEP_BYTES // bytes_per_pixel
    step_pixels = max(_MIN_STEP_PIXELS, min(_MAX_STEP_PIXELS, step_pixels))

    if l % 128 == 0:
        # Sublane-dense layout: fold pixels to (rows, 128).  Free reshapes,
        # native dtypes (cast happens in VMEM inside the kernel).
        s = l // 128
        ts = max(8, (step_pixels // (128 * 8)) * 8)
        if s <= ts:
            ts = s                              # single chunk; full dim is legal
        n_chunks = pl.cdiv(s, ts)
        block_pixels = ts * 128
        x_in = inp.reshape(n, c, s, 128)
        t_in = target.reshape(n, 1, s, 128)
        kernel = functools.partial(
            _dice_kernel_fold, n_classes=c, binary=binary,
            ragged=(s % ts != 0), total_pixels=l, block_pixels=block_pixels)
        in_specs = [
            pl.BlockSpec((None, c, ts, 128), lambda i, j: (i, 0, j, 0)),
            pl.BlockSpec((None, 1, ts, 128), lambda i, j: (i, 0, j, 0)),
        ]
        out_lanes = 128
    else:
        # Ragged fallback: pixels on lanes, last chunk masked in-kernel.
        tl = max(128, (step_pixels // 128) * 128)
        tl = min(tl, pl.cdiv(l, 128) * 128)
        n_chunks = pl.cdiv(l, tl)
        block_pixels = tl
        x_in = inp.reshape(n, c, l)
        t_in = target.reshape(n, 1, l)
        kernel = functools.partial(
            _dice_kernel_flat, n_classes=c, binary=binary,
            ragged=True, total_pixels=l, block_pixels=block_pixels)
        in_specs = [
            pl.BlockSpec((None, c, tl), lambda i, j: (i, 0, j)),
            pl.BlockSpec((None, 1, tl), lambda i, j: (i, 0, j)),
        ]
        out_lanes = tl

    acc = pl.pallas_call(
        kernel,
        out_shape=jax.ShapeDtypeStruct((n, 2, out_lanes), jnp.float32),
        grid=(n, n_chunks),
        in_specs=in_specs,
        out_specs=pl.BlockSpec((None, 2, out_lanes), lambda i, j: (i, 0, 0)),
        compiler_params=pltpu.CompilerParams(
            dimension_semantics=("parallel", "arbitrary"),
            vmem_limit_bytes=_VMEM_LIMIT_BYTES),
    )(x_in, t_in)

    # Tiny epilogue: scalar tree-reduce + dice formula.
    inter = jnp.sum(acc[:, 0, :])
    psum_plus_tsum = jnp.sum(acc[:, 1, :])
    return 1.0 - (2.0 * inter + smooth) / (psum_plus_tsum + smooth)


def _reference(inp, target, smooth=1.0):
    p = jax.nn.softmax(inp.astype(jnp.float32), axis=1)[:, 1]
    iflat = p.reshape(-1)
    tflat = target.astype(jnp.float32).reshape(-1)
    inter = jnp.sum(iflat * tflat)
    return 1.0 - (2.0 * inter + smooth) / (jnp.sum(iflat) + jnp.sum(tflat) + smooth)


if __name__ == "__main__":
    key = jax.random.PRNGKey(0)
    k1, k2, k3, k4 = jax.random.split(key, 4)

    # Multi-class case (general softmax path).
    N, C, H, W = 2, 4, 16, 16
    x = jax.random.normal(k1, (N, C, H, W), dtype=jnp.float32)
    tgt = jax.random.randint(k2, (N, H, W), 0, 2, dtype=jnp.int32)
    loss = jax.block_until_ready(dice_loss_stack(x, tgt, smooth=1.0))
    ref = _reference(x, tgt, smooth=1.0)
    assert jnp.allclose(loss, ref, atol=1e-5, rtol=1e-5), (loss, ref)

    # Binary-class case (C == 2 stable-sigmoid fast path).
    x2 = jax.random.normal(k3, (N, 2, H, W), dtype=jnp.float32)
    tgt2 = jax.random.randint(k4, (N, H, W), 0, 2, dtype=jnp.int32)
    loss2 = jax.block_until_ready(dice_loss_stack(x2, tgt2, smooth=1.0))
    ref2 = _reference(x2, tgt2, smooth=1.0)
    assert jnp.allclose(loss2, ref2, atol=1e-5, rtol=1e-5), (loss2, ref2)

    print("KERNEL_OK")
</pallas_src>

<mosaic_0001>
module attributes {stable_mosaic.version = 11 : i64} {
  func.func @_dice_kernel_fold(%arg0: i32, %arg1: i32, %arg2: memref<1x4x2x128xf32, #tpu.memory_space<vmem>>, %arg3: memref<1x1x2x128xi32, #tpu.memory_space<vmem>>, %arg4: memref<1x2x128xf32, #tpu.memory_space<vmem>>) attributes {dimension_semantics = [#tpu.dimension_semantics<parallel>, #tpu.dimension_semantics<arbitrary>], iteration_bounds = array<i64: 2, 1>, scalar_prefetch = 0 : i64, scratch_operands = 0 : i64, tpu.core_type = #tpu.core_type<tc>, window_params = [{transform_indices = @transform_0, window_bounds = array<i64: 1, 4, 2, 128>}, {transform_indices = @transform_1, window_bounds = array<i64: 1, 1, 2, 128>}, {transform_indices = @transform_2, window_bounds = array<i64: 1, 2, 128>}]} {
    %c0_i32 = arith.constant 0 : i32
    %0 = arith.cmpi eq, %arg1, %c0_i32 : i32
    %1 = arith.extui %0 : i1 to i32
    %c0_i32_0 = arith.constant 0 : i32
    %2 = arith.cmpi ne, %1, %c0_i32_0 : i32
    scf.if %2 {
      %cst_20 = arith.constant 0.000000e+00 : f32
      %59 = vector.broadcast %cst_20 : f32 to vector<2x128xf32>
      %c0_21 = arith.constant 0 : index
      %c0_22 = arith.constant 0 : index
      %c0_23 = arith.constant 0 : index
      %60 = vector.load %arg4[%c0_21, %c0_22, %c0_23] : memref<1x2x128xf32, #tpu.memory_space<vmem>>, vector<1x2x128xf32>
      %61 = vector.shape_cast %60 : vector<1x2x128xf32> to vector<2x128xf32>
      %62 = vector.shape_cast %59 : vector<2x128xf32> to vector<1x2x128xf32>
      tpu.vector_store %arg4[%c0_21, %c0_22, %c0_23], %62 {strides = array<i32>} : memref<1x2x128xf32, #tpu.memory_space<vmem>>, vector<1x2x128xf32>,
    } else {
    }
    %c0 = arith.constant 0 : index
    %c0_1 = arith.constant 0 : index
    %c0_2 = arith.constant 0 : index
    %c0_3 = arith.constant 0 : index
    %3 = vector.load %arg2[%c0, %c0_1, %c0_2, %c0_3] : memref<1x4x2x128xf32, #tpu.memory_space<vmem>>, vector<1x4x2x128xf32>
    %4 = vector.shape_cast %3 : vector<1x4x2x128xf32> to vector<4x2x128xf32>
    %c0_4 = arith.constant 0 : index
    %c0_5 = arith.constant 0 : index
    %c0_6 = arith.constant 0 : index
    %c0_7 = arith.constant 0 : index
    %5 = vector.load %arg3[%c0_4, %c0_5, %c0_6, %c0_7] : memref<1x1x2x128xi32, #tpu.memory_space<vmem>>, vector<1x1x2x128xi32>
    %6 = vector.shape_cast %5 : vector<1x1x2x128xi32> to vector<1x2x128xi32>
    %7 = vector.shape_cast %6 : vector<1x2x128xi32> to vector<2x128xi32>
    %8 = arith.sitofp %7 : vector<2x128xi32> to vector<2x128xf32>
    %9 = vector.extract_strided_slice %4 {offsets = [0, 0, 0], sizes = [1, 2, 128], strides = [1, 1, 1]} : vector<4x2x128xf32> to vector<1x2x128xf32>
    %10 = vector.shape_cast %9 : vector<1x2x128xf32> to vector<2x128xf32>
    %11 = vector.extract_strided_slice %4 {offsets = [1, 0, 0], sizes = [1, 2, 128], strides = [1, 1, 1]} : vector<4x2x128xf32> to vector<1x2x128xf32>
    %12 = vector.shape_cast %11 : vector<1x2x128xf32> to vector<2x128xf32>
    %13 = arith.maximumf %10, %12 : vector<2x128xf32>
    %14 = vector.extract_strided_slice %4 {offsets = [2, 0, 0], sizes = [1, 2, 128], strides = [1, 1, 1]} : vector<4x2x128xf32> to vector<1x2x128xf32>
    %15 = vector.shape_cast %14 : vector<1x2x128xf32> to vector<2x128xf32>
    %16 = arith.maximumf %13, %15 : vector<2x128xf32>
    %17 = vector.extract_strided_slice %4 {offsets = [3, 0, 0], sizes = [1, 2, 128], strides = [1, 1, 1]} : vector<4x2x128xf32> to vector<1x2x128xf32>
    %18 = vector.shape_cast %17 : vector<1x2x128xf32> to vector<2x128xf32>
    %19 = arith.maximumf %16, %18 : vector<2x128xf32>
    %20 = vector.extract_strided_slice %4 {offsets = [1, 0, 0], sizes = [1, 2, 128], strides = [1, 1, 1]} : vector<4x2x128xf32> to vector<1x2x128xf32>
    %21 = vector.shape_cast %20 : vector<1x2x128xf32> to vector<2x128xf32>
    %22 = arith.subf %21, %19 : vector<2x128xf32>
    %23 = math.exp %22 : vector<2x128xf32>
    %24 = vector.extract_strided_slice %4 {offsets = [0, 0, 0], sizes = [1, 2, 128], strides = [1, 1, 1]} : vector<4x2x128xf32> to vector<1x2x128xf32>
    %25 = vector.shape_cast %24 : vector<1x2x128xf32> to vector<2x128xf32>
    %26 = arith.subf %25, %19 : vector<2x128xf32>
    %27 = math.exp %26 : vector<2x128xf32>
    %28 = arith.addf %27, %23 : vector<2x128xf32>
    %29 = vector.extract_strided_slice %4 {offsets = [2, 0, 0], sizes = [1, 2, 128], strides = [1, 1, 1]} : vector<4x2x128xf32> to vector<1x2x128xf32>
    %30 = vector.shape_cast %29 : vector<1x2x128xf32> to vector<2x128xf32>
    %31 = arith.subf %30, %19 : vector<2x128xf32>
    %32 = math.exp %31 : vector<2x128xf32>
    %33 = arith.addf %28, %32 : vector<2x128xf32>
    %34 = vector.extract_strided_slice %4 {offsets = [3, 0, 0], sizes = [1, 2, 128], strides = [1, 1, 1]} : vector<4x2x128xf32> to vector<1x2x128xf32>
    %35 = vector.shape_cast %34 : vector<1x2x128xf32> to vector<2x128xf32>
    %36 = arith.subf %35, %19 : vector<2x128xf32>
    %37 = math.exp %36 : vector<2x128xf32>
    %38 = arith.addf %33, %37 : vector<2x128xf32>
    %39 = tpu.reciprocal %38 : vector<2x128xf32> -> vector<2x128xf32>
    %40 = arith.mulf %23, %39 : vector<2x128xf32>
    %41 = arith.mulf %40, %8 : vector<2x128xf32>
    %cst = arith.constant dense<0.000000e+00> : vector<128xf32>
    %42 = vector.multi_reduction <add>, %41, %cst [0] : vector<2x128xf32> to vector<128xf32>
    %43 = vector.shape_cast %42 : vector<128xf32> to vector<1x128xf32>
    %44 = arith.addf %40, %8 : vector<2x128xf32>
    %cst_8 = arith.constant dense<0.000000e+00> : vector<128xf32>
    %45 = vector.multi_reduction <add>, %44, %cst_8 [0] : vector<2x128xf32> to vector<128xf32>
    %46 = vector.shape_cast %45 : vector<128xf32> to vector<1x128xf32>
    %c0_9 = arith.constant 0 : index
    %c0_10 = arith.constant 0 : index
    %c0_11 = arith.constant 0 : index
    %47 = vector.load %arg4[%c0_9, %c0_10, %c0_11] : memref<1x2x128xf32, #tpu.memory_space<vmem>>, vector<1x1x128xf32>
    %48 = vector.shape_cast %47 : vector<1x1x128xf32> to vector<1x128xf32>
    %49 = arith.addf %48, %43 : vector<1x128xf32>
    %c0_12 = arith.constant 0 : index
    %c0_13 = arith.constant 0 : index
    %c0_14 = arith.constant 0 : index
    %50 = vector.load %arg4[%c0_12, %c0_13, %c0_14] : memref<1x2x128xf32, #tpu.memory_space<vmem>>, vector<1x1x128xf32>
    %51 = vector.shape_cast %50 : vector<1x1x128xf32> to vector<1x128xf32>
    %52 = vector.shape_cast %49 : vector<1x128xf32> to vector<1x1x128xf32>
    tpu.vector_store %arg4[%c0_12, %c0_13, %c0_14], %52 {strides = array<i32>} : memref<1x2x128xf32, #tpu.memory_space<vmem>>, vector<1x1x128xf32>,
    %c0_15 = arith.constant 0 : index
    %c1 = arith.constant 1 : index
    %c0_16 = arith.constant 0 : index
    %53 = vector.load %arg4[%c0_15, %c1, %c0_16] : memref<1x2x128xf32, #tpu.memory_space<vmem>>, vector<1x1x128xf32>
    %54 = vector.shape_cast %53 : vector<1x1x128xf32> to vector<1x128xf32>
    %55 = arith.addf %54, %46 : vector<1x128xf32>
    %c0_17 = arith.constant 0 : index
    %c1_18 = arith.constant 1 : index
    %c0_19 = arith.constant 0 : index
    %56 = vector.load %arg4[%c0_17, %c1_18, %c0_19] : memref<1x2x128xf32, #tpu.memory_space<vmem>>, vector<1x1x128xf32>
    %57 = vector.shape_cast %56 : vector<1x1x128xf32> to vector<1x128xf32>
    %58 = vector.shape_cast %55 : vector<1x128xf32> to vector<1x1x128xf32>
    tpu.vector_store %arg4[%c0_17, %c1_18, %c0_19], %58 {strides = array<i32>} : memref<1x2x128xf32, #tpu.memory_space<vmem>>, vector<1x1x128xf32>,
    return
  }
  func.func @transform_0(%arg0: i32, %arg1: i32) -> (i32, i32, i32, i32) {
    %c0_i32 = arith.constant 0 : i32
    %c0_i32_0 = arith.constant 0 : i32
    %c0_i32_1 = arith.constant 0 : i32
    return %arg0, %c0_i32, %arg1, %c0_i32_0 : i32, i32, i32, i32
  }
  func.func @transform_1(%arg0: i32, %arg1: i32) -> (i32, i32, i32, i32) {
    %c0_i32 = arith.constant 0 : i32
    %c0_i32_0 = arith.constant 0 : i32
    %c0_i32_1 = arith.constant 0 : i32
    return %arg0, %c0_i32, %arg1, %c0_i32_0 : i32, i32, i32, i32
  }
  func.func @transform_2(%arg0: i32, %arg1: i32) -> (i32, i32, i32) {
    %c0_i32 = arith.constant 0 : i32
    %c0_i32_0 = arith.constant 0 : i32
    %c0_i32_1 = arith.constant 0 : i32
    return %arg0, %c0_i32, %c0_i32_0 : i32, i32, i32
  }
}

</mosaic_0001>

<bundles_post_ra>
// kernel: tpu_custom_call.1
= control target key start
LH: loop header
LB: loop body
LE: loop exit
PB: predicated region body
PF: predicated region fallthrough
CT: control target
= control target key end

     0   :  { %7 = vsyncpa [#allocation3], 0  ;;  %s821_s0 = inlined_call_operand.hbm [shape: f32[2,4,2,128], index: 0, kind: input, shape index: {}]   ;;  %s822_s1 = inlined_call_operand.hbm [shape: s32[2,1,2,128], index: 1, kind: input, shape index: {}]   ;;  %s823_s2 = inlined_call_operand.hbm [shape: f32[2,2,128], index: 2, kind: output, shape index: {}]  }
   0x1   :  { %9 = vsyncpa [#allocation3 + $0x1], 0 }
   0x2   :  { %10 = vsyncpa [#allocation6], 0 }
   0x3   :  { %12 = vsyncpa [#allocation6 + $0x1], 0 }
   0x4   :  { %13 = vsyncpa [#allocation4], 0 }
   0x5   :  { %15 = vsyncpa [#allocation4 + $0x1], 0  ;;  %s672_s9 = smov 0   ;;  %s674_s10 = smov 0  }
   0x6   :  { %s676_s11 = smov 0   ;;  %s678_s12 = smov 0  }
   0x7   :  { %s680_s13 = smov 0   ;;  %s682_s14 = smov 0  }
   0x8 LB: > { %s408_s15 = sadd.s32 4294967295, %s652_s14   ;;  %s409_s16 = sadd.s32 4294967294, %s652_s14   ;;  %s652_s14 = sphi %s682_s14, %s21_s14   ;;  %s648_s13 = sphi %s680_s13, %s833_s13   ;;  %s644_s12 = sphi %s678_s12, %s832_s12   ;;  %s640_s11 = sphi %s676_s11, %s831_s11   ;;  %s636_s10 = sphi %s674_s10, %s830_s10   ;;  %s632_s9 = sphi %s672_s9, %s829_s9  }
   0x9   : > { %s33_s17 = sadd.s32 1, %s648_s13  ;;  %s42_s18 = sadd.s32 1, %s640_s11 }
   0xa   : > { %p35_p0 = scmp.ge.s32.totalorder %s33_s17, 2  ;;  %p49_p1 = scmp.ne.s32.totalorder %s640_s11, %s636_s10 }
   0xb   : > { %p50_p2 = scmp.eq.s32.totalorder %s652_s14, 0  ;;  %p55_p3 = scmp.ne.s32.totalorder %s636_s10, %s632_s9 }
   0xc   : > { %s835_s17 = smov (%p35_p0, %s33_s17), 0  ;;  %p56_p5 = scmp.eq.s32.totalorder %s408_s15, 0 }
   0xd   : > { %p713_p4 = por %p50_p2, %p49_p1  ;;  %s37_s20 = ssub.s32 %s648_s13, %s835_s17 }
   0xe   : > { %p107_p6 = scmp.eq.s32.totalorder %s408_s15, 1  ;;  %p40_p7 = scmp.eq.s32.totalorder %s37_s20, 0 }
   0xf   : > { %p719_p8 = por %p56_p5, %p55_p3  ;;  %p113_p10 = scmp.eq.s32.totalorder %s409_s16, 1 }
  0x10   : > { %p723_p9 = por %p107_p6, %p49_p1  ;;  %p411_p12 = scmp.ge.s32.totalorder %s652_s14, 2 }
  0x11   : > { %s728_s23 = scalar_select %p40_p7, %s640_s11, %s42_s18  }
  0x12   : > { %p730_p11 = por %p113_p10, %p55_p3  ;;  %p443_p13 = scmp.lt.s32.totalorder %s652_s14, 2 }
  0x13   : > { %s133_s25 = sand.u32 1, %s640_s11   ;;  %s425_s27 = sshll.u32 %s648_s13, 3 }
  0x14   : > { %s412_s26 = sshll.u32 %s133_s25, 3  ;;  %s143_s30 = scalar_lea.hbm %s821_s0, %s425_s27 }
  0x15   : > { %s137_s3 = scalar_lea.vmem [#allocation2], %s412_s26  ;;  %s144_s5 = sshll.u32 %s143_s30, 4  ;;  %s145_s5 = int_to_ptr.hbm [resolvable:$true] %s144_s5 }
  0x16   : > { %s146_s4 = sshll.u32 %s137_s3, 4  ;;  %p743_p0 = pnand %p443_p13, %p713_p4  ;;  %s147_s4 = int_to_ptr.vmem [resolvable:$true] %s146_s4 }
  0x17   : > { %p417_p1 = scmp.ge.s32.totalorder %s652_s14, 1  ;;  %s134_s7 = scalar_lea.sflag [#allocation3], %s133_s25 }
  0x18   : > { %s654_s8 = smov 32   ;;  %s655_s15 = smov 2  }
  0x19   : > { %435 = dma.hbm_to_vmem [thread:$0]  (!%p743_p0), %s145_s5, 128, %s147_s4, %s134_s7, %s654_s8, %s654_s8, %s655_s15  }
  0x1a   : > { %p174_p2 = scmp.lt.s32.totalorder %s652_s14, 3  ;;  %s415_s16 = sshll.u32 %s133_s25, 1 }
  0x1b   : > { %s416_s18 = sshll.u32 %s648_s13, 1  ;;  %s160_s27 = scalar_lea.vmem [#allocation5], %s415_s16 }
  0x1c   : > { %p175_p3 = pnand %p417_p1, %p174_p2  ;;  %s165_s19 = scalar_lea.hbm %s822_s1, %s416_s18 }
  0x1d   : > { %s169_s28 = sshll.u32 %s160_s27, 4  ;;  %s167_s29 = sshll.u32 %s165_s19, 4  ;;  %s170_s28 = int_to_ptr.vmem [resolvable:$true] %s169_s28  ;;  %s168_s29 = int_to_ptr.hbm [resolvable:$true] %s167_s29 }
  0x1e   : > { %s157_s30 = scalar_lea.sflag [#allocation6], %s133_s25  ;;  %178 = sbr.rel (%p175_p3) target bundleno = 105 (0x69), region = 28 }
  0x1f   : > { %438 = dma.hbm_to_vmem [thread:$0]  (!%p743_p0), %s168_s29, 32, %s170_s28, %s157_s30  }
  0x20   : > { %s758_s3 = sand.u32 (!%p175_p3), 1, %s636_s10  }
  0x21   : > { %s418_s4 = sshll.u32 (!%p175_p3), %s758_s3, 3  ;;  %s181_s5 = scalar_lea.sflag (!%p175_p3), [#allocation3], %s758_s3 }
  0x22   : > { %s184_s7 = scalar_lea.vmem (!%p175_p3), [#allocation2], %s418_s4 }
  0x23   : > { %619 = dma.done.wait (%p719_p8), %s181_s5, 128  }
  0x24   : > { %621 = vsyncadd (%p719_p8), %s181_s5, 4294967168  ;;  %s419_s25 = sshll.u32 %s758_s3, 1  ;;  %s191_s6 = scalar_lea.sflag [#allocation6], %s758_s3 }
  0x25   : > { %s768_s8 = scalar_lea.vmem [#allocation5], %s419_s25 }
  0x26   : > { %623 = dma.done.wait (%p719_p8), %s191_s6, 32  }
  0x27   : > { %625 = vsyncadd (%p719_p8), %s191_s6, 4294967264  ;;  %s774_s15 = scalar_lea.vmem [#allocation7], %s419_s25  ;;  %v656_v0 = vmov 0.0   ;;  %v226_v1 = vld [vmem:[%s184_s7] sm:$0x3]  ;;  %vm266_vm4 = vcmask 1041408  }
  0x28   : > { %225 = vst [vmem:[%s774_s15] sm:$0x3] %v656_v0  ;;  %v227_v2 = vld [vmem:[%s184_s7 + $0x2] sm:$0x3]  ;;  %v228_v3 = vld [vmem:[%s184_s7 + $0x4] sm:$0x3]  ;;  %s422_s21 = sshll.u32 %s644_s12, 1 }
  0x29   : > { %v232_v4 = vmax.f32 %v226_v1, %v227_v2  ;;  %v229_v5 = vld [vmem:[%s184_s7 + $0x6] sm:$0x3]  ;;  %v230_v29 = vld [vmem:[%s768_s8] sm:$0x3]  ;;  %s299_s20 = scalar_lea.hbm %s823_s2, %s422_s21  ;;  %s301_s26 = sshll.u32 %s774_s15, 4  ;;  %s302_s26 = int_to_ptr.vmem [resolvable:$true] %s301_s26 }
  0x2a   : > { %v231_v32 = vcvt.s32.f32 %v230_v29  ;;  %s303_s19 = sshll.u32 %s299_s20, 4  ;;  %s289_s12 = scalar_lea.sflag [#allocation4], %s758_s3  ;;  %s304_s19 = int_to_ptr.hbm [resolvable:$true] %s303_s19 }
  0x2b   : > { %v233_v6 = vmax.f32 %v232_v4, %v228_v3  ;;  %s580_s27 = sshra.s32 %s304_s19, 4  ;;  %s586_s4 = scalar_lea.hbm %s823_s2, 4  ;;  %s581_s27 = int_to_ptr.hbm [resolvable:$true] %s580_s27 }
  0x2c   : > { %s582_s28 = scalar_lea.hbm %s581_s27, 2  ;;  %p587_p7 = scmp.lt.s32.totalorder %s581_s27, %s823_s2 }
  0x2d   : > { %v234_v7 = vmax.f32 %v233_v6, %v229_v5  ;;  %p583_p4 = scmp.ne.s32.totalorder %s581_s27, %s582_s28  ;;  %p588_p8 = scmp.lt.s32.totalorder %s586_s4, %s582_s28 }
  0x2f   : > { %v235_v8 = vsub.f32 %v227_v2, %v234_v7  ;;  %v238_v9 = vsub.f32 %v226_v1, %v234_v7  ;;  %v242_v10 = vsub.f32 %v228_v3, %v234_v7  ;;  %v246_v11 = vsub.f32 %v229_v5, %v234_v7  ;;  %v282_v50 = vld [vmem:[%s774_s15] sm:$0x1]  ;;  %v285_v51 = vld [vmem:[%s774_s15 + $0x1] sm:$0x1]  ;;  %p584_p5 = pnand %p583_p4, %p723_p9  ;;  %p589_p10 = por %p588_p8, %p587_p7 }
  0x31   : > { %v236_v12 = vmul.f32 1.442695, %v235_v8  ;;  %v239_v13 = vmul.f32 1.442695, %v238_v9  ;;  %v243_v14 = vmul.f32 1.442695, %v242_v10  ;;  %p585_p6 = pneg %p584_p5 }
  0x32   : > { %v247_v15 = vmul.f32 1.442695, %v246_v11 }
  0x33   : > { %496 = vpow2.f32 %v236_v12  ;;  %p590_p13 = pnand %p589_p10, %p585_p6 }
  0x34   : > { %498 = vpow2.f32 %v239_v13 }
  0x35   : > { %500 = vpow2.f32 %v243_v14 }
  0x36   : > { %502 = vpow2.f32 %v247_v15 }
  0x39   : > { %v497_v16 = vpop.eup %496 }
  0x3a   : > { %v499_v17 = vpop.eup %498 }
  0x3b   : > { %v501_v18 = vpop.eup %500  ;;  %v241_v19 = vadd.f32 %v499_v17, %v497_v16 }
  0x3c   : > { %v503_v20 = vpop.eup %502 }
  0x3d   : > { %v245_v21 = vadd.f32 %v501_v18, %v241_v19 }
  0x3f   : > { %v249_v22 = vadd.f32 %v503_v20, %v245_v21 }
  0x41   : > { %504 = vrcp.f32 %v249_v22  ;;  %v261_v25 = vand.u32 2147483648, %v249_v22  ;;  %vm255_vm0 = vweird.f32 %v249_v22  ;;  %v259_v27 = vand.u32 2147483647, %v249_v22 }
  0x43   : > { %v262_v30 = vor.u32 1.1754944e-38, %v261_v25  ;;  %vm260_vm3 = vcmp.eq.f32.partialorder %v259_v27, 8.507059e+37 }
  0x47   : > { %v505_v23 = vpop.eup %504 }
  0x48   : > { %v251_v24 = vmul.f32 %v505_v23, %v249_v22  ;;  %vm256_vm1 = vweird.f32 %v505_v23 }
  0x49   : > { %vm257_vm2 = vmor %vm255_vm0, %vm256_vm1 }
  0x4a   : > { %v252_v26 = vsub.f32 1.0, %v251_v24 }
  0x4c   : > { %v253_v28 = vmul.f32 %v505_v23, %v252_v26 }
  0x4e   : > { %v254_v31 = vadd.f32 %v505_v23, %v253_v28 }
  0x50   : > { %v258_v33 = vsel %vm257_vm2, %v505_v23, %v254_v31 }
  0x51   : > { %v263_v34 = vsel %vm260_vm3, %v262_v30, %v258_v33 }
  0x52   : > { %v264_v35 = vmul.f32 %v497_v16, %v263_v34 }
  0x54   : > { %v265_v36 = vmul.f32 %v264_v35, %v231_v32  ;;  %v274_v37 = vadd.f32 %v264_v35, %v231_v32 }
  0x56   : > { %v267_v38 = vsel %vm266_vm4, %v265_v36, 0.0  ;;  %v275_v39 = vsel %vm266_vm4, %v274_v37, 0.0 }
  0x57   : > { %v268_v40 = vrot.slane %v267_v38, 4  ;;  %v276_v41 = vrot.slane %v275_v39, 4 }
  0x59   : > { %v269_v42 = vadd.f32 %v268_v40, %v267_v38  ;;  %v277_v43 = vadd.f32 %v276_v41, %v275_v39 }
  0x5b   : > { %v270_v44 = vrot.slane %v269_v42, 2  ;;  %v278_v45 = vrot.slane %v277_v43, 2 }
  0x5d   : > { %v271_v46 = vadd.f32 %v270_v44, %v269_v42  ;;  %v279_v47 = vadd.f32 %v278_v45, %v277_v43 }
  0x5f   : > { %v272_v48 = vrot.slane %v271_v46, 1  ;;  %v280_v49 = vrot.slane %v279_v47, 1 }
  0x61   : > { %v273_v52 = vadd.f32 %v272_v48, %v271_v46  ;;  %v281_v53 = vadd.f32 %v280_v49, %v279_v47 }
  0x63   : > { %v283_v54 = vadd.f32 %v282_v50, %v273_v52  ;;  %v286_v55 = vadd.f32 %v285_v51, %v281_v53 }
  0x65   : > { %284 = vst [vmem:[%s774_s15] sm:$0x1] %v283_v54 }
  0x66   : > { %287 = vst [vmem:[%s774_s15 + $0x1] sm:$0x1] %v286_v55 }
  0x67   : > { %593 = shalt.err (!%p590_p13)
}
  0x68   : > { %430 = dma.vmem_to_hbm [thread:$0]  (%p723_p9), %s302_s26, 32, %s304_s19, %s289_s12  }
  0x69 PF: > { %s315_s3 = sand.u32 1, %s632_s9   ;;  %p440_p0 = pnand %p411_p12, %p730_p11 }
  0x6a   : > { %s316_s25 = scalar_lea.sflag [#allocation4], %s315_s3 }
  0x6b   : > { %p441_p1 = pneg %p440_p0 }
  0x6d   : > { %627 = dma.done.wait (%p441_p1), %s316_s25, 32  }
  0x6e   : > { %629 = vsyncadd (%p441_p1), %s316_s25, 4294967264  ;;  %s21_s14 = sadd.s32 1, %s652_s14   ;;  %s829_s9 = smov %s636_s10 }
  0x6f   : > { %p18_p2 = scmp.ge.s32.totalorder %s21_s14, 4   ;;  %s830_s10 = smov %s640_s11 }
  0x70   : > { %s831_s11 = smov %s728_s23  ;;  %s832_s12 = smov %s648_s13 }
  0x71   : > { %s833_s13 = smov %s835_s17  ;;  %20 = sbr.rel (!%p18_p2) target bundleno = 8 (0x8), region = 90 }
  0x76   :  { %322 = vsyncpa [#allocation3], 1 }
  0x77   :  { %324 = vsyncpa [#allocation3 + $0x1], 1 }
  0x78   :  { %325 = vsyncpa [#allocation6], 1 }
  0x79   :  { %327 = vsyncpa [#allocation6 + $0x1], 1 }
  0x7a   :  { %328 = vsyncpa [#allocation4], 1 }
  0x7b   :  { %330 = vsyncpa [#allocation4 + $0x1], 1 }

</bundles_post_ra>
